<compile_context>
chip_gen: v7x
topology: tpu7x:2x2x1
jax: 0.10.0
libtpu: 0.0.40
codegen_flags: <defaults>
</compile_context>

<pallas_src>
import jax
import jax.numpy as jnp
import numpy as np
from jax.experimental import pallas as pl
from jax.experimental.pallas import tpu as pltpu


def _round_up(x, m):
    return ((x + m - 1) // m) * m


def _conv_mm_kernel(x_ref, w_ref, b_ref, o_ref):
    # x_ref: (1, K, tm)      bf16   im2col slab tile, output positions on lanes
    # w_ref: (Coutp, K)      bf16   resident folded weight
    # b_ref: (Coutp, 1)      f32    resident (t-folded) bias
    # o_ref: (1, Coutp, tm)  out dtype (lane-dense store)
    acc = jnp.dot(w_ref[...], x_ref[0], preferred_element_type=jnp.float32)
    # bias add kept in f32 (v5e VPU has no bf16); single cast at the store.
    o_ref[0] = (acc + b_ref[...]).astype(o_ref.dtype)


def _run_matmul(slab, w2, b2, *, N, K, Mpad, tm, Coutp, out_dtype,
                flops, bytes_accessed, single_buffer_resident):
    # Resident operands: constant index map; optionally single-buffered to
    # reclaim VMEM headroom (matters for large Ce on v7x's 64 MiB VMEM).
    resident_kwargs = (dict(pipeline_mode=pl.Buffered(1))
                       if single_buffer_resident else {})
    return pl.pallas_call(
        _conv_mm_kernel,
        out_shape=jax.ShapeDtypeStruct((N, Coutp, Mpad), out_dtype),
        grid_spec=pltpu.PrefetchScalarGridSpec(
            num_scalar_prefetch=0,
            grid=(N, Mpad // tm),
            in_specs=[
                pl.BlockSpec((1, K, tm), lambda n, m: (n, 0, m)),
                pl.BlockSpec((Coutp, K), lambda n, m: (0, 0), **resident_kwargs),
                pl.BlockSpec((Coutp, 1), lambda n, m: (0, 0), **resident_kwargs),
            ],
            out_specs=pl.BlockSpec((1, Coutp, tm), lambda n, m: (n, 0, m)),
        ),
        compiler_params=pltpu.CompilerParams(
            # Both axes independent (no cross-step accumulation) -> megacore can
            # shard either; the M axis gives v7x's 2 TCs work even when N == 1.
            dimension_semantics=("parallel", "parallel"),
            # Tiles here are small (tens of KB); 32 MiB is safe on v5e/v6e/v7x.
            # Raise toward ~64 MiB on v6e / keep <=48 MiB on v7x if tm is grown.
            vmem_limit_bytes=32 * 1024 * 1024,
        ),
        cost_estimate=pl.CostEstimate(flops=flops, transcendentals=0,
                                      bytes_accessed=bytes_accessed),
    )(slab, w2, b2)


def concat_conv2d_forward(t, x, weight, bias, *, stride=1, padding=0, dilation=1,
                          tm_max=512, compute_dtype=jnp.bfloat16,
                          out_dtype=jnp.bfloat16):
    """ConcatConv2d.forward(t, x): Conv2d(concat([t*ones, x], ch=1)) + bias.

    t: scalar; x: (N, Cin, H, W) f32 NCHW; weight: (Cout, Cin+1, KH, KW);
    bias: (Cout,). Returns (N, Cout, Ho, Wo) in `out_dtype`.
    Pass compute_dtype=out_dtype=jnp.float32 for a full-precision path.
    """
    # TODO(synk): stride>1, groups>1 and transpose=True (ConvTranspose2d) paths
    # are not implemented in this fused kernel.
    assert stride == 1, "fused Pallas path supports stride=1 only"

    N, Cin, H, W = x.shape
    Cout, Cin1, KH, KW = weight.shape
    assert Cin1 == Cin + 1
    t = jnp.asarray(t, jnp.float32)

    if padding == 0:
        # Fold the constant t channel into the bias (exact when padding == 0):
        # its contribution is t * sum_{kh,kw} W[o, 0, kh, kw] at every output.
        bias_eff = (bias.astype(jnp.float32)
                    + t * weight[:, 0].sum(axis=(1, 2)).astype(jnp.float32))
        w_use = weight[:, 1:]                       # (Cout, Cin, KH, KW)
        x_use = x
    else:
        bias_eff = bias.astype(jnp.float32)
        tt = jnp.broadcast_to(t.astype(x.dtype), (N, 1, H, W))
        x_use = jnp.concatenate([tt, x], axis=1)
        x_use = jnp.pad(x_use, ((0, 0), (0, 0),
                                (padding, padding), (padding, padding)))
        w_use = weight                              # t channel zero-padded at borders

    Ce = w_use.shape[1]
    Hp, Wp = x_use.shape[2], x_use.shape[3]
    Ho = Hp - dilation * (KH - 1)
    Wo = Wp - dilation * (KW - 1)
    M = Ho * Wo                                     # valid positions only
    K = KH * KW * Ce                                # fused contraction dim

    # Wrapper-side im2col (layout plumbing, no conv math), transposed so the
    # flattened (oh, ow) axis lands on lanes inside the kernel.
    taps = []
    for kh in range(KH):
        for kw in range(KW):
            taps.append(x_use[:, :, kh * dilation: kh * dilation + Ho,
                                     kw * dilation: kw * dilation + Wo])
    slab = jnp.stack(taps, axis=1)                  # (N, KH*KW, Ce, Ho, Wo)
    slab = slab.reshape(N, K, M).astype(compute_dtype)

    # Spatial tile: lane axis -> multiple of 128; pad M up to a tile multiple.
    tm = min(_round_up(tm_max, 128), _round_up(M, 128))
    Mpad = _round_up(M, tm)
    slab = jnp.pad(slab, ((0, 0), (0, 0), (0, Mpad - M)))

    # Cout padded to a multiple of 16: clean sublane tiling for f32 and bf16.
    Coutp = _round_up(Cout, 16)
    w2 = jnp.transpose(w_use, (0, 2, 3, 1)).reshape(Cout, K)   # k = ((kh,kw),c)
    w2 = jnp.pad(w2, ((0, Coutp - Cout), (0, 0))).astype(compute_dtype)
    b2 = jnp.pad(bias_eff.reshape(Cout, 1), ((0, Coutp - Cout), (0, 0)))

    # Advisory cost: real work only (no lane / channel / M padding).
    flops = 2 * N * M * K * Cout
    bytes_accessed = int(N * M * K * slab.dtype.itemsize
                         + Cout * K * w2.dtype.itemsize + Cout * 4
                         + N * M * Cout * np.dtype(out_dtype).itemsize)

    kwargs = dict(N=N, K=K, Mpad=Mpad, tm=tm, Coutp=Coutp, out_dtype=out_dtype,
                  flops=flops, bytes_accessed=bytes_accessed)
    try:
        out = _run_matmul(slab, w2, b2, single_buffer_resident=True, **kwargs)
    except Exception:
        # Fallback for jax versions without BlockSpec.pipeline_mode / Buffered(1):
        # let the tiny resident weight/bias be double-buffered instead.
        out = _run_matmul(slab, w2, b2, single_buffer_resident=False, **kwargs)

    # Drop channel / spatial padding; layout is already (N, Cout, Ho, Wo) NCHW.
    return out[:, :Cout, :M].reshape(N, Cout, Ho, Wo)


if __name__ == "__main__":
    key = jax.random.PRNGKey(0)
    kx, kw, kb = jax.random.split(key, 3)

    # Small shapes consistent with the module: batch=2, dim_in=4, dim_out=4, 16x16.
    N, Cin, H, W = 2, 4, 16, 16
    Cout, KS = 4, 3

    x = jax.random.normal(kx, (N, Cin, H, W), jnp.float32)
    t = jnp.float32(0.5)

    # Deterministic init mirroring nn.Conv2d defaults (uniform +/- 1/sqrt(fan_in)).
    fan_in = (Cin + 1) * KS * KS
    bound = 1.0 / (fan_in ** 0.5)
    weight = jax.random.uniform(kw, (Cout, Cin + 1, KS, KS), jnp.float32, -bound, bound)
    bias = jax.random.uniform(kb, (Cout,), jnp.float32, -bound, bound)

    def reference(pad):
        tt = jnp.ones_like(x[:, :1, :, :]) * t
        ttx = jnp.concatenate([tt, x], axis=1)
        return jax.lax.conv_general_dilated(
            ttx, weight, window_strides=(1, 1),
            padding=[(pad, pad), (pad, pad)],
            dimension_numbers=("NCHW", "OIHW", "NCHW"),
        ) + bias.reshape(1, Cout, 1, 1)

    # padding=0 (module default): t channel folded into the bias.
    y0 = jax.block_until_ready(concat_conv2d_forward(t, x, weight, bias, padding=0))
    r0 = reference(0)
    assert y0.shape == (N, Cout, H - KS + 1, W - KS + 1)
    assert jnp.allclose(y0.astype(jnp.float32), r0, rtol=2e-2, atol=2e-2)

    # padding=1: explicit t channel carried through the im2col slab.
    y1 = jax.block_until_ready(concat_conv2d_forward(t, x, weight, bias, padding=1))
    r1 = reference(1)
    assert y1.shape == (N, Cout, H, W)
    assert jnp.allclose(y1.astype(jnp.float32), r1, rtol=2e-2, atol=2e-2)

    print("KERNEL_OK")
</pallas_src>

<mosaic_0001>
module attributes {stable_mosaic.version = 11 : i64} {
  func.func @_conv_mm_kernel(%arg0: i32, %arg1: i32, %arg2: memref<1x36x256xbf16, #tpu.memory_space<vmem>>, %arg3: memref<16x36xbf16, #tpu.memory_space<vmem>>, %arg4: memref<16x1xf32, #tpu.memory_space<vmem>>, %arg5: memref<1x16x256xbf16, #tpu.memory_space<vmem>>) attributes {dimension_semantics = [#tpu.dimension_semantics<parallel>, #tpu.dimension_semantics<parallel>], iteration_bounds = array<i64: 2, 1>, scalar_prefetch = 0 : i64, scratch_operands = 0 : i64, tpu.core_type = #tpu.core_type<tc>, window_params = [{transform_indices = @transform_0, window_bounds = array<i64: 1, 36, 256>}, {pipeline_mode = #tpu.pipeline_mode<synchronous>, transform_indices = @transform_1, window_bounds = array<i64: 16, 36>}, {pipeline_mode = #tpu.pipeline_mode<synchronous>, transform_indices = @transform_2, window_bounds = array<i64: 16, 1>}, {transform_indices = @transform_3, window_bounds = array<i64: 1, 16, 256>}]} {
    %c0 = arith.constant 0 : index
    %c0_0 = arith.constant 0 : index
    %0 = vector.load %arg3[%c0, %c0_0] : memref<16x36xbf16, #tpu.memory_space<vmem>>, vector<16x36xbf16>
    %c0_1 = arith.constant 0 : index
    %c0_2 = arith.constant 0 : index
    %c0_3 = arith.constant 0 : index
    %1 = vector.load %arg2[%c0_1, %c0_2, %c0_3] : memref<1x36x256xbf16, #tpu.memory_space<vmem>>, vector<1x36x256xbf16>
    %2 = vector.shape_cast %1 : vector<1x36x256xbf16> to vector<36x256xbf16>
    %cst = arith.constant dense<0.000000e+00> : vector<16x256xf32>
    %3 = tpu.matmul %0, %2, %cst {dimension_numbers = #tpu.dot_dimension_numbers<[1], [0], [0], [1], [0, 0, 1, 1], [], []>} : vector<16x36xbf16>, vector<36x256xbf16>, vector<16x256xf32> -> vector<16x256xf32>
    %c0_4 = arith.constant 0 : index
    %c0_5 = arith.constant 0 : index
    %4 = vector.load %arg4[%c0_4, %c0_5] : memref<16x1xf32, #tpu.memory_space<vmem>>, vector<16x1xf32>
    %5 = vector.broadcast %4 : vector<16x1xf32> to vector<16x256xf32>
    %6 = arith.addf %3, %5 : vector<16x256xf32>
    %7 = arith.truncf %6 : vector<16x256xf32> to vector<16x256xbf16>
    %c0_6 = arith.constant 0 : index
    %c0_7 = arith.constant 0 : index
    %c0_8 = arith.constant 0 : index
    %8 = vector.load %arg5[%c0_6, %c0_7, %c0_8] : memref<1x16x256xbf16, #tpu.memory_space<vmem>>, vector<1x16x256xbf16>
    %9 = vector.shape_cast %8 : vector<1x16x256xbf16> to vector<16x256xbf16>
    %10 = vector.shape_cast %7 : vector<16x256xbf16> to vector<1x16x256xbf16>
    tpu.vector_store %arg5[%c0_6, %c0_7, %c0_8], %10 {strides = array<i32>} : memref<1x16x256xbf16, #tpu.memory_space<vmem>>, vector<1x16x256xbf16>,
    return
  }
  func.func @transform_0(%arg0: i32, %arg1: i32) -> (i32, i32, i32) {
    %c0_i32 = arith.constant 0 : i32
    %c0_i32_0 = arith.constant 0 : i32
    return %arg0, %c0_i32, %arg1 : i32, i32, i32
  }
  func.func @transform_1(%arg0: i32, %arg1: i32) -> (i32, i32) {
    %c0_i32 = arith.constant 0 : i32
    %c0_i32_0 = arith.constant 0 : i32
    %c0_i32_1 = arith.constant 0 : i32
    return %c0_i32, %c0_i32_0 : i32, i32
  }
  func.func @transform_2(%arg0: i32, %arg1: i32) -> (i32, i32) {
    %c0_i32 = arith.constant 0 : i32
    %c0_i32_0 = arith.constant 0 : i32
    %c0_i32_1 = arith.constant 0 : i32
    return %c0_i32, %c0_i32_0 : i32, i32
  }
  func.func @transform_3(%arg0: i32, %arg1: i32) -> (i32, i32, i32) {
    %c0_i32 = arith.constant 0 : i32
    %c0_i32_0 = arith.constant 0 : i32
    return %arg0, %c0_i32, %arg1 : i32, i32, i32
  }
}

module attributes {stable_mosaic.version = 11 : i64} {
  func.func @_conv_mm_kernel(%arg0: i32, %arg1: i32, %arg2: memref<1x36x256xbf16, #tpu.memory_space<vmem>>, %arg3: memref<16x36xbf16, #tpu.memory_space<vmem>>, %arg4: memref<16x1xf32, #tpu.memory_space<vmem>>, %arg5: memref<1x16x256xbf16, #tpu.memory_space<vmem>>) attributes {dimension_semantics = [#tpu.dimension_semantics<parallel>, #tpu.dimension_semantics<parallel>], iteration_bounds = array<i64: 2, 1>, scalar_prefetch = 0 : i64, scratch_operands = 0 : i64, tpu.core_type = #tpu.core_type<tc>, window_params = [{transform_indices = @transform_0, window_bounds = array<i64: 1, 36, 256>}, {pipeline_mode = #tpu.pipeline_mode<synchronous>, transform_indices = @transform_1, window_bounds = array<i64: 16, 36>}, {pipeline_mode = #tpu.pipeline_mode<synchronous>, transform_indices = @transform_2, window_bounds = array<i64: 16, 1>}, {transform_indices = @transform_3, window_bounds = array<i64: 1, 16, 256>}]} {
    %c0 = arith.constant 0 : index
    %c0_0 = arith.constant 0 : index
    %0 = vector.load %arg3[%c0, %c0_0] : memref<16x36xbf16, #tpu.memory_space<vmem>>, vector<16x36xbf16>
    %c0_1 = arith.constant 0 : index
    %c0_2 = arith.constant 0 : index
    %c0_3 = arith.constant 0 : index
    %1 = vector.load %arg2[%c0_1, %c0_2, %c0_3] : memref<1x36x256xbf16, #tpu.memory_space<vmem>>, vector<1x36x256xbf16>
    %2 = vector.shape_cast %1 : vector<1x36x256xbf16> to vector<36x256xbf16>
    %cst = arith.constant dense<0.000000e+00> : vector<16x256xf32>
    %3 = tpu.matmul %0, %2, %cst {dimension_numbers = #tpu.dot_dimension_numbers<[1], [0], [0], [1], [0, 0, 1, 1], [], []>} : vector<16x36xbf16>, vector<36x256xbf16>, vector<16x256xf32> -> vector<16x256xf32>
    %c0_4 = arith.constant 0 : index
    %c0_5 = arith.constant 0 : index
    %4 = vector.load %arg4[%c0_4, %c0_5] : memref<16x1xf32, #tpu.memory_space<vmem>>, vector<16x1xf32>
    %5 = vector.broadcast %4 : vector<16x1xf32> to vector<16x256xf32>
    %6 = arith.addf %3, %5 : vector<16x256xf32>
    %7 = arith.truncf %6 : vector<16x256xf32> to vector<16x256xbf16>
    %c0_6 = arith.constant 0 : index
    %c0_7 = arith.constant 0 : index
    %c0_8 = arith.constant 0 : index
    %8 = vector.load %arg5[%c0_6, %c0_7, %c0_8] : memref<1x16x256xbf16, #tpu.memory_space<vmem>>, vector<1x16x256xbf16>
    %9 = vector.shape_cast %8 : vector<1x16x256xbf16> to vector<16x256xbf16>
    %10 = vector.shape_cast %7 : vector<16x256xbf16> to vector<1x16x256xbf16>
    tpu.vector_store %arg5[%c0_6, %c0_7, %c0_8], %10 {strides = array<i32>} : memref<1x16x256xbf16, #tpu.memory_space<vmem>>, vector<1x16x256xbf16>,
    return
  }
  func.func @transform_0(%arg0: i32, %arg1: i32) -> (i32, i32, i32) {
    %c0_i32 = arith.constant 0 : i32
    %c0_i32_0 = arith.constant 0 : i32
    return %arg0, %c0_i32, %arg1 : i32, i32, i32
  }
  func.func @transform_1(%arg0: i32, %arg1: i32) -> (i32, i32) {
    %c0_i32 = arith.constant 0 : i32
    %c0_i32_0 = arith.constant 0 : i32
    %c0_i32_1 = arith.constant 0 : i32
    return %c0_i32, %c0_i32_0 : i32, i32
  }
  func.func @transform_2(%arg0: i32, %arg1: i32) -> (i32, i32) {
    %c0_i32 = arith.constant 0 : i32
    %c0_i32_0 = arith.constant 0 : i32
    %c0_i32_1 = arith.constant 0 : i32
    return %c0_i32, %c0_i32_0 : i32, i32
  }
  func.func @transform_3(%arg0: i32, %arg1: i32) -> (i32, i32, i32) {
    %c0_i32 = arith.constant 0 : i32
    %c0_i32_0 = arith.constant 0 : i32
    return %arg0, %c0_i32, %arg1 : i32, i32, i32
  }
}

</mosaic_0001>

<bundles_post_ra>
// kernel: tpu_custom_call.1
= control target key start
LH: loop header
LB: loop body
LE: loop exit
PB: predicated region body
PF: predicated region fallthrough
CT: control target
= control target key end

     0   :  { %8 = vsyncpa [#allocation3], 0  ;;  %s736_s0 = inlined_call_operand.vmem [shape: bf16[2,36,256], index: 0, kind: input, shape index: {}]   ;;  %s737_s1 = inlined_call_operand.vmem [shape: bf16[16,36], index: 1, kind: input, shape index: {}]   ;;  %s738_s2 = inlined_call_operand.vmem [shape: f32[16,1], index: 2, kind: input, shape index: {}]   ;;  %s739_s3 = inlined_call_operand.hbm [shape: bf16[2,16,256], index: 3, kind: output, shape index: {}]  }
   0x1   :  { %10 = vsyncpa [#allocation3 + $0x1], 0  ;;  %s612_s12 = smov 0   ;;  %s614_s13 = smov 0  }
   0x2   :  { %s616_s14 = smov 0   ;;  %s618_s15 = smov 0  }
   0x3   :  { %s620_s16 = smov 0   ;;  %s622_s17 = smov 0  }
   0x4 LB: > { %s413_s18 = sadd.s32 4294967295, %s586_s17   ;;  %s414_s19 = sadd.s32 4294967294, %s586_s17   ;;  %s586_s17 = sphi %s622_s17, %s16_s17   ;;  %s582_s16 = sphi %s620_s16, %s746_s16   ;;  %s578_s15 = sphi %s618_s15, %s745_s15   ;;  %s574_s14 = sphi %s616_s14, %s744_s14   ;;  %s570_s13 = sphi %s614_s13, %s743_s13   ;;  %s566_s12 = sphi %s612_s12, %s742_s12  }
   0x5   : > { %s28_s20 = sadd.s32 1, %s582_s16  ;;  %s107_s21 = sadd.s32 1, %s574_s14 }
   0x6   : > { %p30_p0 = scmp.ge.s32.totalorder %s28_s20, 2  ;;  %p117_p1 = scmp.ne.s32.totalorder %s574_s14, %s570_s13 }
   0x7   : > { %p118_p2 = scmp.eq.s32.totalorder %s413_s18, 1  ;;  %p123_p3 = scmp.ne.s32.totalorder %s570_s13, %s566_s12 }
   0x8   : > { %s748_s20 = smov (%p30_p0, %s28_s20), 0  ;;  %p124_p5 = scmp.eq.s32.totalorder %s414_s19, 1 }
   0x9   : > { %p652_p4 = por %p118_p2, %p117_p1  ;;  %s102_s23 = ssub.s32 %s582_s16, %s748_s20 }
   0xa   : > { %p417_p6 = scmp.ge.s32.totalorder %s586_s17, 1  ;;  %p105_p7 = scmp.eq.s32.totalorder %s102_s23, 0 }
   0xb   : > { %p659_p8 = por %p124_p5, %p123_p3  ;;  %p161_p9 = scmp.lt.s32.totalorder %s586_s17, 3 }
   0xc   : > { %s665_s25 = scalar_select %p105_p7, %s574_s14, %s107_s21  }
   0xd   : > { %p162_p10 = pnand %p417_p6, %p161_p9 }
   0xe   : > { %p190_p11 = scmp.lt.s32.totalorder (!%p162_p10), %s578_s15, 1  ;;  %v588_v0 = vmov (!%p162_p10), 0   ;;  %v208_v1 = vld [vmem:[%s738_s2] sm:$0xff] (!%p162_p10)  ;;  %v209_v2 = vld [vmem:[%s738_s2 + $0x8] sm:$0xff] (!%p162_p10)  ;;  %vm254_vm0 = vcmask (!%p162_p10), 1041408   ;;  %vm250_vm1 = vcmask (!%p162_p10), 293888  }
   0xf   : > { %165 = sbr.rel (%p162_p10) target bundleno = 274 (0x112), region = 32  ;;  %293 = vmatprep.mubr.bf16.mxu0 (!%p162_p10), %v588_v0  ;;  %498 = vset.pattern.permute.xlu0 (!%p162_p10), %v588_v0  ;;  %v507_v11 = vld [vmem:[%s737_s1] sm:$0xff] (!%p162_p10)   ;;  %s186_s10 = sand.u32 (!%p162_p10), 1, %s570_s13  }
  0x10   : > { %212 = vperm.xlu0 (!%p162_p10), %498, %v208_v1   ;;  %s418_s11 = sshll.u32 (!%p162_p10), %s186_s10, 4  ;;  %s438_s21 = sshll.u32 (!%p162_p10), %s578_s15, 8 }
  0x11   : > { %s188_s18 = scalar_lea.vmem (!%p162_p10), [#allocation2], %s418_s11  ;;  %s688_s27 = scalar_lea.hbm (!%p162_p10), %s739_s3, %s438_s21 }
  0x12   : > { %s334_s19 = sshll.u32 (!%p162_p10), %s188_s18, 4  ;;  %s589_s29 = smov (!%p162_p10), [#allocation2]   ;;  %s683_s19 = int_to_ptr.vmem [resolvable:$true] %s334_s19 }
  0x13   : > { %s512_s30 = sshll.u32 (!%p162_p10), %s589_s29, 4  ;;  %s513_s30 = int_to_ptr.vmem [resolvable:$false] %s512_s30 }
  0x14   : > { %217 = vperm.xlu0 (!%p162_p10), %498, %v209_v2   ;;  %p515_p1 = scmp.lt.s32.totalorder (!%p162_p10), %s683_s19, %s513_s30 }
  0x16   : > { %s191_s28 = scalar_select %p190_p11, %s578_s15, 1 }
  0x17   : > { %s508_s15 = scalar_lea.vmem %s683_s19, 256 }
  0x18   : > { %s439_s4 = smul.u32 40, %s191_s28  ;;  %s690_s28 = scalar_lea.sflag [#allocation3], %s186_s10 }
  0x19   : > { %p509_p12 = scmp.ne.s32.totalorder %s683_s19, %s508_s15 }
  0x1a   : > { %s197_s7 = scalar_lea.vmem %s736_s0, %s439_s4  ;;  %s514_s4 = scalar_lea.vmem %s513_s30, 512 }
  0x1b   : > { %v499_v3 = vld [vmem:[%s197_s7 + $0x4] ss:$8 sps:$4 sm:$0xff]   ;;  %v501_v4 = vld [vmem:[%s197_s7] ss:$8 sps:$4 sm:$0xff]   ;;  %v502_v5 = vld [vmem:[%s197_s7 + $0x14] ss:$8 sps:$4 sm:$0xff]   ;;  %p510_p13 = pnand %p509_p12, %p652_p4  ;;  %p516_p2 = scmp.lt.s32.totalorder %s514_s4, %s508_s15 }
  0x1c   : > { %261 = vmatprep.subr.bf16.mxu0 %v499_v3  ;;  %v207_v6 = vld [vmem:[%s197_s7 + $0x20] sm:$0x33]  ;;  %v504_v7 = vld [vmem:[%s197_s7 + $0x10] ss:$8 sps:$4 sm:$0xff]  }
  0x1d   : > { %262 = vmatpush1.bf16.msra.mxu0 %v501_v4  ;;  %v426_v8 = vcombine.high %v207_v6, %v207_v6  ;;  %v425_v9 = vcombine.low %v207_v6, %v207_v6  ;;  %p511_p0 = pneg %p510_p13  ;;  %p517_p3 = por %p516_p2, %p515_p1 }
  0x1e   : > { %263 = vmatprep.subr.bf16.mxu0 %v502_v5 }
  0x1f   : > { %v256_v10 = vsel %vm254_vm0, %v425_v9, 0  ;;  %p518_p5 = pnand %p517_p3, %p511_p0 }
  0x21   : > { %264 = vmatpush1.bf16.msra.mxu0 %v504_v7 }
  0x22   : > { %427 = vmatprep.subr.msk.bf16.mxu0 %vm254_vm0, %v426_v8 }
  0x25   : > { %266 = vmatpush1.bf16.msra.mxu0 %v256_v10 }
  0x28   : > { %428 = vmatmul.mubr.msk.bf16.vlgmr.msra.gmra.mrb[0].mxu0 %vm250_vm1, %v507_v11 }
  0x8f   : > { %v213_v12 = vpop.permute.xlu0 %212 }
  0x93   : > { %v218_v16 = vpop.permute.xlu0 %217 }
  0xfb   : > { %v295_v13 = vpop.f32.mrb[0].mxu0 }
  0xfc   : > { %v296_v14 = vadd.f32 %v295_v13, %v213_v12  ;;  %v297_v15 = vpop.f32.mrb[1].mxu0 }
  0xfd   : > { %v298_v17 = vadd.f32 %v297_v15, %v213_v12  ;;  %v299_v18 = vpop.f32.mrb[2].mxu0 }
  0xfe   : > { %v300_v19 = vadd.f32 %v299_v18, %v218_v16  ;;  %v301_v20 = vpop.f32.mrb[3].mxu0 }
  0xff   : > { %v436_v21 = vpack.c.bf16 %v298_v17, %v296_v14  ;;  %v302_v22 = vadd.f32 %v301_v20, %v218_v16 }
 0x101   : > { %316 = vst [vmem:[%s188_s18] sm:$0xff] %v436_v21  ;;  %v437_v23 = vpack.c.bf16 %v302_v22, %v300_v19 }
 0x103   : > { %317 = vst [vmem:[%s188_s18 + $0x8] sm:$0xff] %v437_v23 }
 0x104   : > { %521 = shalt.err (!%p518_p5)
}
 0x105   : > { %s522_s5 = scalar_lea.hbm %s688_s27, 256  ;;  %s526_s8 = scalar_lea.hbm %s739_s3, 512 }
 0x106   : > { %p523_p6 = scmp.ne.s32.totalorder %s688_s27, %s522_s5  ;;  %p527_p10 = scmp.lt.u32.totalorder %s688_s27, %s739_s3 }
 0x107   : > { %p528_p11 = scmp.lt.u32.totalorder %s526_s8, %s522_s5  ;;  %p530_p13 = scmp.lt.u32.totalorder %s522_s5, %s688_s27 }
 0x108   : > { %p524_p7 = pnand %p523_p6, %p652_p4 }
 0x109   : > { %p529_p12 = por %p528_p11, %p527_p10 }
 0x10a   : > { %p525_p9 = pneg %p524_p7 }
 0x10b   : > { %p531_p0 = por %p530_p13, %p529_p12 }
 0x10d   : > { %p532_p1 = pnand %p531_p0, %p525_p9 }
 0x10f   : > { %535 = shalt.err (!%p532_p1)
}
 0x110   : > { %s590_s11 = smov 128   ;;  %s591_s18 = smov 8  }
 0x111   : > { %440 = dma.vmem_to_hbm [thread:$0]  (%p652_p4), %s683_s19, 256, %s688_s27, %s690_s28, %s590_s11, %s590_s11, %s591_s18  }
 0x112 PF: > { %p446_p2 = scmp.ge.s32.totalorder %s586_s17, 2  ;;  %s349_s21 = sand.u32 1, %s566_s12  }
 0x113   : > { %s350_s23 = scalar_lea.sflag [#allocation3], %s349_s21 }
 0x114   : > { %p443_p3 = pnand %p446_p2, %p659_p8 }
 0x116   : > { %561 = dma.done.wait (!%p443_p3), %s350_s23, 256  }
 0x117   : > { %563 = vsyncadd (!%p443_p3), %s350_s23, 4294967040  ;;  %s16_s17 = sadd.s32 1, %s586_s17   ;;  %s742_s12 = smov %s570_s13 }
 0x118   : > { %p13_p5 = scmp.ge.s32.totalorder %s16_s17, 4   ;;  %s743_s13 = smov %s574_s14 }
 0x119   : > { %s744_s14 = smov %s665_s25  ;;  %s745_s15 = smov %s582_s16 }
 0x11a   : > { %s746_s16 = smov %s748_s20  ;;  %15 = sbr.rel (!%p13_p5) target bundleno = 4 (0x4), region = 67 }
 0x121   :  { %355 = vsyncpa [#allocation3], 1 }
 0x122   :  { %357 = vsyncpa [#allocation3 + $0x1], 1 }

// kernel: tpu_custom_call.1
= control target key start
LH: loop header
LB: loop body
LE: loop exit
PB: predicated region body
PF: predicated region fallthrough
CT: control target
= control target key end

     0   :  { %8 = vsyncpa [#allocation3], 0  ;;  %s736_s0 = inlined_call_operand.vmem [shape: bf16[2,36,256], index: 0, kind: input, shape index: {}]   ;;  %s737_s1 = inlined_call_operand.vmem [shape: bf16[16,36], index: 1, kind: input, shape index: {}]   ;;  %s738_s2 = inlined_call_operand.vmem [shape: f32[16,1], index: 2, kind: input, shape index: {}]   ;;  %s739_s3 = inlined_call_operand.hbm [shape: bf16[2,16,256], index: 3, kind: output, shape index: {}]  }
   0x1   :  { %10 = vsyncpa [#allocation3 + $0x1], 0  ;;  %s612_s12 = smov 0   ;;  %s614_s13 = smov 0  }
   0x2   :  { %s616_s14 = smov 0   ;;  %s618_s15 = smov 0  }
   0x3   :  { %s620_s16 = smov 0   ;;  %s622_s17 = smov 0  }
   0x4 LB: > { %s413_s18 = sadd.s32 4294967295, %s586_s17   ;;  %s414_s19 = sadd.s32 4294967294, %s586_s17   ;;  %s586_s17 = sphi %s622_s17, %s16_s17   ;;  %s582_s16 = sphi %s620_s16, %s746_s16   ;;  %s578_s15 = sphi %s618_s15, %s745_s15   ;;  %s574_s14 = sphi %s616_s14, %s744_s14   ;;  %s570_s13 = sphi %s614_s13, %s743_s13   ;;  %s566_s12 = sphi %s612_s12, %s742_s12  }
   0x5   : > { %s28_s20 = sadd.s32 1, %s582_s16  ;;  %s107_s21 = sadd.s32 1, %s574_s14 }
   0x6   : > { %p30_p0 = scmp.ge.s32.totalorder %s28_s20, 2  ;;  %p117_p1 = scmp.ne.s32.totalorder %s574_s14, %s570_s13 }
   0x7   : > { %p118_p2 = scmp.eq.s32.totalorder %s413_s18, 1  ;;  %p123_p3 = scmp.ne.s32.totalorder %s570_s13, %s566_s12 }
   0x8   : > { %s748_s20 = smov (%p30_p0, %s28_s20), 0  ;;  %p124_p5 = scmp.eq.s32.totalorder %s414_s19, 1 }
   0x9   : > { %p652_p4 = por %p118_p2, %p117_p1  ;;  %s102_s23 = ssub.s32 %s582_s16, %s748_s20 }
   0xa   : > { %p417_p6 = scmp.ge.s32.totalorder %s586_s17, 1  ;;  %p105_p7 = scmp.eq.s32.totalorder %s102_s23, 0 }
   0xb   : > { %p659_p8 = por %p124_p5, %p123_p3  ;;  %p161_p9 = scmp.lt.s32.totalorder %s586_s17, 3 }
   0xc   : > { %s665_s25 = scalar_select %p105_p7, %s574_s14, %s107_s21  }
   0xd   : > { %p162_p10 = pnand %p417_p6, %p161_p9 }
   0xe   : > { %p190_p11 = scmp.lt.s32.totalorder (!%p162_p10), %s578_s15, 1  ;;  %v588_v0 = vmov (!%p162_p10), 0   ;;  %v208_v1 = vld [vmem:[%s738_s2] sm:$0xff] (!%p162_p10)  ;;  %v209_v2 = vld [vmem:[%s738_s2 + $0x8] sm:$0xff] (!%p162_p10)  ;;  %vm254_vm0 = vcmask (!%p162_p10), 1041408   ;;  %vm250_vm1 = vcmask (!%p162_p10), 293888  }
   0xf   : > { %165 = sbr.rel (%p162_p10) target bundleno = 274 (0x112), region = 32  ;;  %293 = vmatprep.mubr.bf16.mxu0 (!%p162_p10), %v588_v0  ;;  %498 = vset.pattern.permute.xlu0 (!%p162_p10), %v588_v0  ;;  %v507_v11 = vld [vmem:[%s737_s1] sm:$0xff] (!%p162_p10)   ;;  %s186_s10 = sand.u32 (!%p162_p10), 1, %s570_s13  }
  0x10   : > { %212 = vperm.xlu0 (!%p162_p10), %498, %v208_v1   ;;  %s418_s11 = sshll.u32 (!%p162_p10), %s186_s10, 4  ;;  %s438_s21 = sshll.u32 (!%p162_p10), %s578_s15, 8 }
  0x11   : > { %s188_s18 = scalar_lea.vmem (!%p162_p10), [#allocation2], %s418_s11  ;;  %s688_s27 = scalar_lea.hbm (!%p162_p10), %s739_s3, %s438_s21 }
  0x12   : > { %s334_s19 = sshll.u32 (!%p162_p10), %s188_s18, 4  ;;  %s589_s29 = smov (!%p162_p10), [#allocation2]   ;;  %s683_s19 = int_to_ptr.vmem [resolvable:$true] %s334_s19 }
  0x13   : > { %s512_s30 = sshll.u32 (!%p162_p10), %s589_s29, 4  ;;  %s513_s30 = int_to_ptr.vmem [resolvable:$false] %s512_s30 }
  0x14   : > { %217 = vperm.xlu0 (!%p162_p10), %498, %v209_v2   ;;  %p515_p1 = scmp.lt.s32.totalorder (!%p162_p10), %s683_s19, %s513_s30 }
  0x16   : > { %s191_s28 = scalar_select %p190_p11, %s578_s15, 1 }
  0x17   : > { %s508_s15 = scalar_lea.vmem %s683_s19, 256 }
  0x18   : > { %s439_s4 = smul.u32 40, %s191_s28  ;;  %s690_s28 = scalar_lea.sflag [#allocation3], %s186_s10 }
  0x19   : > { %p509_p12 = scmp.ne.s32.totalorder %s683_s19, %s508_s15 }
  0x1a   : > { %s197_s7 = scalar_lea.vmem %s736_s0, %s439_s4  ;;  %s514_s4 = scalar_lea.vmem %s513_s30, 512 }
  0x1b   : > { %v499_v3 = vld [vmem:[%s197_s7 + $0x4] ss:$8 sps:$4 sm:$0xff]   ;;  %v501_v4 = vld [vmem:[%s197_s7] ss:$8 sps:$4 sm:$0xff]   ;;  %v502_v5 = vld [vmem:[%s197_s7 + $0x14] ss:$8 sps:$4 sm:$0xff]   ;;  %p510_p13 = pnand %p509_p12, %p652_p4  ;;  %p516_p2 = scmp.lt.s32.totalorder %s514_s4, %s508_s15 }
  0x1c   : > { %261 = vmatprep.subr.bf16.mxu0 %v499_v3  ;;  %v207_v6 = vld [vmem:[%s197_s7 + $0x20] sm:$0x33]  ;;  %v504_v7 = vld [vmem:[%s197_s7 + $0x10] ss:$8 sps:$4 sm:$0xff]  }
  0x1d   : > { %262 = vmatpush1.bf16.msra.mxu0 %v501_v4  ;;  %v426_v8 = vcombine.high %v207_v6, %v207_v6  ;;  %v425_v9 = vcombine.low %v207_v6, %v207_v6  ;;  %p511_p0 = pneg %p510_p13  ;;  %p517_p3 = por %p516_p2, %p515_p1 }
  0x1e   : > { %263 = vmatprep.subr.bf16.mxu0 %v502_v5 }
  0x1f   : > { %v256_v10 = vsel %vm254_vm0, %v425_v9, 0  ;;  %p518_p5 = pnand %p517_p3, %p511_p0 }
  0x21   : > { %264 = vmatpush1.bf16.msra.mxu0 %v504_v7 }
  0x22   : > { %427 = vmatprep.subr.msk.bf16.mxu0 %vm254_vm0, %v426_v8 }
  0x25   : > { %266 = vmatpush1.bf16.msra.mxu0 %v256_v10 }
  0x28   : > { %428 = vmatmul.mubr.msk.bf16.vlgmr.msra.gmra.mrb[0].mxu0 %vm250_vm1, %v507_v11 }
  0x8f   : > { %v213_v12 = vpop.permute.xlu0 %212 }
  0x93   : > { %v218_v16 = vpop.permute.xlu0 %217 }
  0xfb   : > { %v295_v13 = vpop.f32.mrb[0].mxu0 }
  0xfc   : > { %v296_v14 = vadd.f32 %v295_v13, %v213_v12  ;;  %v297_v15 = vpop.f32.mrb[1].mxu0 }
  0xfd   : > { %v298_v17 = vadd.f32 %v297_v15, %v213_v12  ;;  %v299_v18 = vpop.f32.mrb[2].mxu0 }
  0xfe   : > { %v300_v19 = vadd.f32 %v299_v18, %v218_v16  ;;  %v301_v20 = vpop.f32.mrb[3].mxu0 }
  0xff   : > { %v436_v21 = vpack.c.bf16 %v298_v17, %v296_v14  ;;  %v302_v22 = vadd.f32 %v301_v20, %v218_v16 }
 0x101   : > { %316 = vst [vmem:[%s188_s18] sm:$0xff] %v436_v21  ;;  %v437_v23 = vpack.c.bf16 %v302_v22, %v300_v19 }
 0x103   : > { %317 = vst [vmem:[%s188_s18 + $0x8] sm:$0xff] %v437_v23 }
 0x104   : > { %521 = shalt.err (!%p518_p5)
}
 0x105   : > { %s522_s5 = scalar_lea.hbm %s688_s27, 256  ;;  %s526_s8 = scalar_lea.hbm %s739_s3, 512 }
 0x106   : > { %p523_p6 = scmp.ne.s32.totalorder %s688_s27, %s522_s5  ;;  %p527_p10 = scmp.lt.u32.totalorder %s688_s27, %s739_s3 }
 0x107   : > { %p528_p11 = scmp.lt.u32.totalorder %s526_s8, %s522_s5  ;;  %p530_p13 = scmp.lt.u32.totalorder %s522_s5, %s688_s27 }
 0x108   : > { %p524_p7 = pnand %p523_p6, %p652_p4 }
 0x109   : > { %p529_p12 = por %p528_p11, %p527_p10 }
 0x10a   : > { %p525_p9 = pneg %p524_p7 }
 0x10b   : > { %p531_p0 = por %p530_p13, %p529_p12 }
 0x10d   : > { %p532_p1 = pnand %p531_p0, %p525_p9 }
 0x10f   : > { %535 = shalt.err (!%p532_p1)
}
 0x110   : > { %s590_s11 = smov 128   ;;  %s591_s18 = smov 8  }
 0x111   : > { %440 = dma.vmem_to_hbm [thread:$0]  (%p652_p4), %s683_s19, 256, %s688_s27, %s690_s28, %s590_s11, %s590_s11, %s591_s18  }
 0x112 PF: > { %p446_p2 = scmp.ge.s32.totalorder %s586_s17, 2  ;;  %s349_s21 = sand.u32 1, %s566_s12  }
 0x113   : > { %s350_s23 = scalar_lea.sflag [#allocation3], %s349_s21 }
 0x114   : > { %p443_p3 = pnand %p446_p2, %p659_p8 }
 0x116   : > { %561 = dma.done.wait (!%p443_p3), %s350_s23, 256  }
 0x117   : > { %563 = vsyncadd (!%p443_p3), %s350_s23, 4294967040  ;;  %s16_s17 = sadd.s32 1, %s586_s17   ;;  %s742_s12 = smov %s570_s13 }
 0x118   : > { %p13_p5 = scmp.ge.s32.totalorder %s16_s17, 4   ;;  %s743_s13 = smov %s574_s14 }
 0x119   : > { %s744_s14 = smov %s665_s25  ;;  %s745_s15 = smov %s582_s16 }
 0x11a   : > { %s746_s16 = smov %s748_s20  ;;  %15 = sbr.rel (!%p13_p5) target bundleno = 4 (0x4), region = 67 }
 0x121   :  { %355 = vsyncpa [#allocation3], 1 }
 0x122   :  { %357 = vsyncpa [#allocation3 + $0x1], 1 }

</bundles_post_ra>
